<compile_context>
chip_gen: v6e
topology: v6e:2x2x1
jax: 0.10.0
libtpu: 0.0.40
codegen_flags: <defaults>
</compile_context>

<pallas_src>
import jax
import jax.numpy as jnp
from jax.experimental import pallas as pl
from jax.experimental.pallas import tpu as pltpu

IN_FEATURES = 784          # 1 * 28 * 28
H0 = 128                   # hidden_0 width
H1 = 64                    # hidden_1 width
NUM_CLASSES = 10


def _round_up(n, m):
    return ((n + m - 1) // m) * m


def mlp_logsoftmax_kernel(x_ref, w0_ref, b0_ref, w1_ref, b1_ref,
                          w2_ref, b2_ref, o_ref):
    # x_ref: (bt, 784) f32 tile of the flattened batch; cast to bf16 in-kernel
    # (MXU-native input, accumulation stays f32).
    x = x_ref[...].astype(jnp.bfloat16)

    # hidden_0: Linear(784, 128) + ReLU   (dropout == identity in eval mode)
    h0 = jnp.dot(x, w0_ref[...], preferred_element_type=jnp.float32)
    h0 = jnp.maximum(h0 + b0_ref[...], 0.0)

    # hidden_1: Linear(128, 64) + ReLU
    h1 = jnp.dot(h0.astype(jnp.bfloat16), w1_ref[...],
                 preferred_element_type=jnp.float32)
    h1 = jnp.maximum(h1 + b1_ref[...], 0.0)

    # output: Linear(64, 10)
    logits = jnp.dot(h1.astype(jnp.bfloat16), w2_ref[...],
                     preferred_element_type=jnp.float32)
    logits = logits + b2_ref[...]

    # LogSoftmax over dim=1, numerically stable (f32, 10 real lanes only).
    m = jnp.max(logits, axis=-1, keepdims=True)
    shifted = logits - m
    lse = jnp.log(jnp.sum(jnp.exp(shifted), axis=-1, keepdims=True))
    o_ref[...] = shifted - lse


def prepare_params(params):
    """One-time cast of the weights/biases (hoisted out of the per-call path).

    params: w0 (784,128), b0 (1,128), w1 (128,64), b1 (1,64),
            w2 (64,10),  b2 (1,10) -- weights stored transposed as (in, out).
    """
    return {
        "w0": params["w0"].astype(jnp.bfloat16),
        "b0": params["b0"].reshape(1, H0).astype(jnp.float32),
        "w1": params["w1"].astype(jnp.bfloat16),
        "b1": params["b1"].reshape(1, H1).astype(jnp.float32),
        "w2": params["w2"].astype(jnp.bfloat16),
        "b2": params["b2"].reshape(1, NUM_CLASSES).astype(jnp.float32),
    }


def _choose_batch_tile(B, batch_tile):
    """Balanced, 8-aligned batch tile; >= 2 grid steps when B > 8 (v7x)."""
    nsteps = max(pl.cdiv(B, batch_tile), 1)
    if B > 8:
        nsteps = max(nsteps, 2)            # keep both v7x TCs busy
    bt = _round_up(max(pl.cdiv(B, nsteps), 1), 8)
    nsteps = pl.cdiv(B, bt)
    return bt, nsteps


def _vmem_limit_bytes(bt):
    x_tile = bt * IN_FEATURES * 4                                   # f32 input tile
    out_tile = bt * 128 * 4                                         # output tile (lane-padded layout)
    weights = 2 * (IN_FEATURES * H0 + H0 * H1 + H1 * NUM_CLASSES)   # bf16, resident
    biases = 4 * (H0 + H1 + NUM_CLASSES)
    temps = bt * (IN_FEATURES * 2 + 3 * 128 * 4)                    # bf16 x copy + h0/h1/logits f32
    est = 2 * (x_tile + out_tile) + 2 * (weights + biases) + temps
    # 1.5x headroom + compiler scratch, modest floor, 48 MiB cap (v7x: 64 MiB/TC).
    return int(min(48 << 20, max(int(1.5 * est) + (4 << 20), 8 << 20)))


def network_forward(x_nchw, prepared, *, batch_tile=2048):
    """Forward pass of the PyTorch `Network` with a single Pallas kernel.

    x_nchw:   (B, 1, 28, 28) float32 (NCHW, like PyTorch).
    prepared: output of prepare_params().
    returns:  (B, 10) float32 log-probabilities.
    """
    B = x_nchw.shape[0]
    x2d = x_nchw.reshape(B, -1).astype(jnp.float32)
    assert x2d.shape[1] == IN_FEATURES

    bt, nsteps = _choose_batch_tile(B, batch_tile)
    B_pad = nsteps * bt
    if B_pad != B:
        # Row-only padding (bounded to < one tile-rounding; no feature padding).
        x2d = jnp.pad(x2d, ((0, B_pad - B), (0, 0)))

    # Weights/biases are tiny (~0.2 MiB in bf16): keep the full tensors resident
    # in VMEM every grid step; only the batch dim is tiled.
    full = lambda a: pl.BlockSpec(a.shape, lambda i: (0, 0))

    out = pl.pallas_call(
        mlp_logsoftmax_kernel,
        out_shape=jax.ShapeDtypeStruct((B_pad, NUM_CLASSES), jnp.float32),
        grid_spec=pltpu.PrefetchScalarGridSpec(
            num_scalar_prefetch=0,
            grid=(nsteps,),
            in_specs=[
                pl.BlockSpec((bt, IN_FEATURES), lambda i: (i, 0)),   # x (f32, natural width)
                full(prepared["w0"]), full(prepared["b0"]),          # hidden_0
                full(prepared["w1"]), full(prepared["b1"]),          # hidden_1
                full(prepared["w2"]), full(prepared["b2"]),          # output
            ],
            out_specs=pl.BlockSpec((bt, NUM_CLASSES), lambda i: (i, 0)),
        ),
        compiler_params=pltpu.CompilerParams(
            dimension_semantics=("parallel",),
            vmem_limit_bytes=_vmem_limit_bytes(bt)),
    )(x2d, prepared["w0"], prepared["b0"], prepared["w1"],
      prepared["b1"], prepared["w2"], prepared["b2"])

    return out if B_pad == B else out[:B]


def init_params(key):
    """Deterministic init mimicking PyTorch nn.Linear default:
    U(-1/sqrt(fan_in), 1/sqrt(fan_in)) for both weight and bias."""
    def linear(key, fan_in, fan_out):
        kw, kb = jax.random.split(key)
        bound = 1.0 / jnp.sqrt(fan_in)
        # stored as (in, out) so the kernel computes x @ W
        w = jax.random.uniform(kw, (fan_in, fan_out), jnp.float32,
                               minval=-bound, maxval=bound)
        b = jax.random.uniform(kb, (1, fan_out), jnp.float32,
                               minval=-bound, maxval=bound)
        return w, b

    k0, k1, k2 = jax.random.split(key, 3)
    w0, b0 = linear(k0, IN_FEATURES, H0)
    w1, b1 = linear(k1, H0, H1)
    w2, b2 = linear(k2, H1, NUM_CLASSES)
    return {"w0": w0, "b0": b0, "w1": w1, "b1": b1, "w2": w2, "b2": b2}


def reference_forward(x_nchw, params):
    """Pure-JAX reference matching the kernel's bf16-input / f32-accum math."""
    bf = jnp.bfloat16
    x = x_nchw.reshape(x_nchw.shape[0], -1).astype(jnp.float32).astype(bf)
    h0 = jnp.maximum(
        jnp.dot(x, params["w0"].astype(bf),
                preferred_element_type=jnp.float32) + params["b0"], 0.0)
    h1 = jnp.maximum(
        jnp.dot(h0.astype(bf), params["w1"].astype(bf),
                preferred_element_type=jnp.float32) + params["b1"], 0.0)
    logits = jnp.dot(h1.astype(bf), params["w2"].astype(bf),
                     preferred_element_type=jnp.float32) + params["b2"]
    return jax.nn.log_softmax(logits, axis=1)


if __name__ == "__main__":
    key = jax.random.PRNGKey(0)
    k_params, k_x = jax.random.split(key)

    params = init_params(k_params)
    prepared = prepare_params(params)

    # Small MNIST-like batch: NCHW (B=16, C=1, H=28, W=28); 1*28*28 = 784.
    # With the default batch_tile=2048 the tile balancer picks bt=8 and a
    # 2-step grid, exercising batch tiling at this small size.
    x = jax.random.normal(k_x, (16, 1, 28, 28), dtype=jnp.float32)

    out = network_forward(x, prepared)
    out = jax.block_until_ready(out)

    ref = reference_forward(x, params)
    assert out.shape == (16, NUM_CLASSES)
    assert jnp.allclose(out, ref, atol=2e-3, rtol=2e-3), "mismatch vs reference"
    # log-softmax rows should sum (in prob space) to 1
    assert jnp.allclose(jnp.sum(jnp.exp(out), axis=1), 1.0, atol=1e-4)

    print("KERNEL_OK")
</pallas_src>

<mosaic_0001>
module attributes {stable_mosaic.version = 11 : i64} {
  func.func @mlp_logsoftmax_kernel(%arg0: i32, %arg1: memref<8x784xf32, #tpu.memory_space<vmem>>, %arg2: memref<784x128xbf16, #tpu.memory_space<vmem>>, %arg3: memref<1x128xf32, #tpu.memory_space<vmem>>, %arg4: memref<128x64xbf16, #tpu.memory_space<vmem>>, %arg5: memref<1x64xf32, #tpu.memory_space<vmem>>, %arg6: memref<64x10xbf16, #tpu.memory_space<vmem>>, %arg7: memref<1x10xf32, #tpu.memory_space<vmem>>, %arg8: memref<8x10xf32, #tpu.memory_space<vmem>>) attributes {dimension_semantics = [#tpu.dimension_semantics<parallel>], iteration_bounds = array<i64: 2>, scalar_prefetch = 0 : i64, scratch_operands = 0 : i64, tpu.core_type = #tpu.core_type<tc>, window_params = [{transform_indices = @transform_0, window_bounds = array<i64: 8, 784>}, {pipeline_mode = #tpu.pipeline_mode<synchronous>, transform_indices = @transform_1, window_bounds = array<i64: 784, 128>}, {pipeline_mode = #tpu.pipeline_mode<synchronous>, transform_indices = @transform_2, window_bounds = array<i64: 1, 128>}, {pipeline_mode = #tpu.pipeline_mode<synchronous>, transform_indices = @transform_3, window_bounds = array<i64: 128, 64>}, {pipeline_mode = #tpu.pipeline_mode<synchronous>, transform_indices = @transform_4, window_bounds = array<i64: 1, 64>}, {pipeline_mode = #tpu.pipeline_mode<synchronous>, transform_indices = @transform_5, window_bounds = array<i64: 64, 10>}, {pipeline_mode = #tpu.pipeline_mode<synchronous>, transform_indices = @transform_6, window_bounds = array<i64: 1, 10>}, {transform_indices = @transform_7, window_bounds = array<i64: 8, 10>}]} {
    %c0 = arith.constant 0 : index
    %c0_0 = arith.constant 0 : index
    %0 = vector.load %arg1[%c0, %c0_0] : memref<8x784xf32, #tpu.memory_space<vmem>>, vector<8x784xf32>
    %1 = arith.truncf %0 : vector<8x784xf32> to vector<8x784xbf16>
    %c0_1 = arith.constant 0 : index
    %c0_2 = arith.constant 0 : index
    %2 = vector.load %arg2[%c0_1, %c0_2] : memref<784x128xbf16, #tpu.memory_space<vmem>>, vector<784x128xbf16>
    %cst = arith.constant dense<0.000000e+00> : vector<8x128xf32>
    %3 = tpu.matmul %1, %2, %cst {dimension_numbers = #tpu.dot_dimension_numbers<[1], [0], [0], [1], [0, 0, 1, 1], [], []>} : vector<8x784xbf16>, vector<784x128xbf16>, vector<8x128xf32> -> vector<8x128xf32>
    %c0_3 = arith.constant 0 : index
    %c0_4 = arith.constant 0 : index
    %4 = vector.load %arg3[%c0_3, %c0_4] : memref<1x128xf32, #tpu.memory_space<vmem>>, vector<1x128xf32>
    %5 = vector.broadcast %4 : vector<1x128xf32> to vector<8x128xf32>
    %6 = arith.addf %3, %5 : vector<8x128xf32>
    %cst_5 = arith.constant 0.000000e+00 : f32
    %7 = vector.broadcast %cst_5 : f32 to vector<8x128xf32>
    %8 = arith.maximumf %6, %7 : vector<8x128xf32>
    %9 = arith.truncf %8 : vector<8x128xf32> to vector<8x128xbf16>
    %c0_6 = arith.constant 0 : index
    %c0_7 = arith.constant 0 : index
    %10 = vector.load %arg4[%c0_6, %c0_7] : memref<128x64xbf16, #tpu.memory_space<vmem>>, vector<128x64xbf16>
    %cst_8 = arith.constant dense<0.000000e+00> : vector<8x64xf32>
    %11 = tpu.matmul %9, %10, %cst_8 {dimension_numbers = #tpu.dot_dimension_numbers<[1], [0], [0], [1], [0, 0, 1, 1], [], []>} : vector<8x128xbf16>, vector<128x64xbf16>, vector<8x64xf32> -> vector<8x64xf32>
    %c0_9 = arith.constant 0 : index
    %c0_10 = arith.constant 0 : index
    %12 = vector.load %arg5[%c0_9, %c0_10] : memref<1x64xf32, #tpu.memory_space<vmem>>, vector<1x64xf32>
    %13 = vector.broadcast %12 : vector<1x64xf32> to vector<8x64xf32>
    %14 = arith.addf %11, %13 : vector<8x64xf32>
    %cst_11 = arith.constant 0.000000e+00 : f32
    %15 = vector.broadcast %cst_11 : f32 to vector<8x64xf32>
    %16 = arith.maximumf %14, %15 : vector<8x64xf32>
    %17 = arith.truncf %16 : vector<8x64xf32> to vector<8x64xbf16>
    %c0_12 = arith.constant 0 : index
    %c0_13 = arith.constant 0 : index
    %18 = vector.load %arg6[%c0_12, %c0_13] : memref<64x10xbf16, #tpu.memory_space<vmem>>, vector<64x10xbf16>
    %cst_14 = arith.constant dense<0.000000e+00> : vector<8x10xf32>
    %19 = tpu.matmul %17, %18, %cst_14 {dimension_numbers = #tpu.dot_dimension_numbers<[1], [0], [0], [1], [0, 0, 1, 1], [], []>} : vector<8x64xbf16>, vector<64x10xbf16>, vector<8x10xf32> -> vector<8x10xf32>
    %c0_15 = arith.constant 0 : index
    %c0_16 = arith.constant 0 : index
    %20 = vector.load %arg7[%c0_15, %c0_16] : memref<1x10xf32, #tpu.memory_space<vmem>>, vector<1x10xf32>
    %21 = vector.broadcast %20 : vector<1x10xf32> to vector<8x10xf32>
    %22 = arith.addf %19, %21 : vector<8x10xf32>
    %cst_17 = arith.constant dense<0xFF800000> : vector<8xf32>
    %23 = vector.multi_reduction <maximumf>, %22, %cst_17 [1] : vector<8x10xf32> to vector<8xf32>
    %24 = vector.shape_cast %23 : vector<8xf32> to vector<8x1xf32>
    %25 = vector.broadcast %24 : vector<8x1xf32> to vector<8x10xf32>
    %26 = arith.subf %22, %25 : vector<8x10xf32>
    %27 = math.exp %26 : vector<8x10xf32>
    %cst_18 = arith.constant dense<0.000000e+00> : vector<8xf32>
    %28 = vector.multi_reduction <add>, %27, %cst_18 [1] : vector<8x10xf32> to vector<8xf32>
    %29 = vector.shape_cast %28 : vector<8xf32> to vector<8x1xf32>
    %30 = math.log %29 : vector<8x1xf32>
    %31 = vector.broadcast %30 : vector<8x1xf32> to vector<8x10xf32>
    %32 = arith.subf %26, %31 : vector<8x10xf32>
    %c0_19 = arith.constant 0 : index
    %c0_20 = arith.constant 0 : index
    %33 = vector.load %arg8[%c0_19, %c0_20] : memref<8x10xf32, #tpu.memory_space<vmem>>, vector<8x10xf32>
    tpu.vector_store %arg8[%c0_19, %c0_20], %32 {strides = array<i32>} : memref<8x10xf32, #tpu.memory_space<vmem>>, vector<8x10xf32>,
    return
  }
  func.func @transform_0(%arg0: i32) -> (i32, i32) {
    %c0_i32 = arith.constant 0 : i32
    %c0_i32_0 = arith.constant 0 : i32
    return %arg0, %c0_i32 : i32, i32
  }
  func.func @transform_1(%arg0: i32) -> (i32, i32) {
    %c0_i32 = arith.constant 0 : i32
    %c0_i32_0 = arith.constant 0 : i32
    %c0_i32_1 = arith.constant 0 : i32
    return %c0_i32, %c0_i32_0 : i32, i32
  }
  func.func @transform_2(%arg0: i32) -> (i32, i32) {
    %c0_i32 = arith.constant 0 : i32
    %c0_i32_0 = arith.constant 0 : i32
    %c0_i32_1 = arith.constant 0 : i32
    return %c0_i32, %c0_i32_0 : i32, i32
  }
  func.func @transform_3(%arg0: i32) -> (i32, i32) {
    %c0_i32 = arith.constant 0 : i32
    %c0_i32_0 = arith.constant 0 : i32
    %c0_i32_1 = arith.constant 0 : i32
    return %c0_i32, %c0_i32_0 : i32, i32
  }
  func.func @transform_4(%arg0: i32) -> (i32, i32) {
    %c0_i32 = arith.constant 0 : i32
    %c0_i32_0 = arith.constant 0 : i32
    %c0_i32_1 = arith.constant 0 : i32
    return %c0_i32, %c0_i32_0 : i32, i32
  }
  func.func @transform_5(%arg0: i32) -> (i32, i32) {
    %c0_i32 = arith.constant 0 : i32
    %c0_i32_0 = arith.constant 0 : i32
    %c0_i32_1 = arith.constant 0 : i32
    return %c0_i32, %c0_i32_0 : i32, i32
  }
  func.func @transform_6(%arg0: i32) -> (i32, i32) {
    %c0_i32 = arith.constant 0 : i32
    %c0_i32_0 = arith.constant 0 : i32
    %c0_i32_1 = arith.constant 0 : i32
    return %c0_i32, %c0_i32_0 : i32, i32
  }
  func.func @transform_7(%arg0: i32) -> (i32, i32) {
    %c0_i32 = arith.constant 0 : i32
    %c0_i32_0 = arith.constant 0 : i32
    return %arg0, %c0_i32 : i32, i32
  }
}

</mosaic_0001>

<bundles_post_ra>
// kernel: tpu_custom_call.1
= control target key start
LH: loop header
LB: loop body
LE: loop exit
PB: predicated region body
PF: predicated region fallthrough
CT: control target
= control target key end

     0   :  { %12 = vsyncpa [#allocation3], 0  ;;  %s1804_s0 = inlined_call_operand.vmem [shape: f32[16,784], index: 0, kind: input, shape index: {}]   ;;  %s1805_s1 = inlined_call_operand.hbm [shape: bf16[784,128], index: 1, kind: input, shape index: {}]   ;;  %s1806_s2 = inlined_call_operand.vmem [shape: f32[1,128], index: 2, kind: input, shape index: {}]   ;;  %s1807_s3 = inlined_call_operand.vmem [shape: bf16[128,64], index: 3, kind: input, shape index: {}]   ;;  %s1808_s4 = inlined_call_operand.vmem [shape: f32[1,64], index: 4, kind: input, shape index: {}]   ;;  %s1809_s5 = inlined_call_operand.vmem [shape: bf16[64,10], index: 5, kind: input, shape index: {}]   ;;  %s1810_s6 = inlined_call_operand.vmem [shape: f32[1,10], index: 6, kind: input, shape index: {}]   ;;  %s1811_s7 = inlined_call_operand.hbm [shape: f32[16,10], index: 7, kind: output, shape index: {}]  }
   0x1   :  { %13 = vsyncpa [#allocation4], 0 }
   0x2   :  { %15 = vsyncpa [#allocation4 + $0x1], 0  ;;  %s1623_s24 = smov 0   ;;  %s1625_s25 = smov 0  }
   0x3   :  { %s1627_s26 = smov 0   ;;  %s1629_s27 = smov 0  }
   0x4 LB: > { %s1644_s28 = sadd.s32 4294967295, %s1575_s27   ;;  %s1167_s29 = sadd.s32 4294967294, %s1575_s27   ;;  %s1575_s27 = sphi %s1629_s27, %s1819_s27   ;;  %s1571_s26 = sphi %s1627_s26, %s1818_s26   ;;  %s1567_s25 = sphi %s1625_s25, %s1817_s25   ;;  %s1563_s24 = sphi %s1623_s24, %s1816_s24  }
   0x5   : > { %s1648_s30 = sadd.s32 1, %s1575_s27   ;;  %s180_s8 = sadd.s32 1, %s1571_s26 }
   0x6   : > { %s177_s9 = ssub.s32 %s1575_s27, %s1648_s30  ;;  %p190_p0 = scmp.ne.s32.totalorder %s1571_s26, %s1567_s25 }
   0x7   : > { %p178_p1 = scmp.eq.s32.totalorder %s177_s9, 0  ;;  %p191_p2 = scmp.eq.s32.totalorder %s1644_s28, 1 }
   0x8   : > { %p196_p3 = scmp.ne.s32.totalorder %s1567_s25, %s1563_s24  ;;  %p197_p4 = scmp.eq.s32.totalorder %s1167_s29, 1 }
   0x9   : > { %s1659_s10 = scalar_select %p178_p1, %s1571_s26, %s180_s8  }
   0xa   : > { %p1661_p5 = por %p191_p2, %p190_p0  ;;  %p1665_p6 = por %p197_p4, %p196_p3 }
   0xb   : > { %p1168_p7 = scmp.ge.s32.totalorder %s1575_s27, 1  ;;  %p204_p8 = scmp.lt.s32.totalorder %s1575_s27, 3 }
   0xc   : > { %s1813_s12 = scalar_select %p1665_p6, 1, 0 }
   0xd   : > { %p1380_p9 = scmp.eq.s32.totalorder %s1644_s28, 0  ;;  %p1672_p10 = pnand %p1168_p7, %p204_p8 }
   0xe   : > { %s1577_s14 = smov [#allocation2]  }
   0xf   : > { %s216_s15 = sshll.u32 %s1577_s14, 4  ;;  %p1372_p11 = pneg %p1672_p10  ;;  %s217_s15 = int_to_ptr.vmem [resolvable:$true] %s216_s15 }
  0x10   : > { %s1496_s16 = scalar_lea.vmem %s217_s15, 6272  ;;  %p1504_p3 = scmp.lt.s32.totalorder %s217_s15, %s217_s15 }
  0x11   : > { %p1373_p12 = pnand %p1380_p9, %p1372_p11  ;;  %p1497_p0 = scmp.ne.s32.totalorder %s217_s15, %s1496_s16 }
  0x12   : > { %p1505_p4 = scmp.lt.s32.totalorder %s1496_s16, %s1496_s16 }
  0x13   : > { %p1487_p13 = pneg %p1373_p12 }
  0x14   : > { %p1506_p6 = por %p1505_p4, %p1504_p3 }
  0x15   : > { %p1499_p1 = pnand %p1497_p0, %p1487_p13 }
  0x17   : > { %p1500_p2 = pneg %p1499_p1 }
  0x19   : > { %p1507_p7 = pnand %p1506_p6, %p1500_p2 }
  0x1b   : > { %1510 = shalt.err (!%p1507_p7)
}
  0x1c   : > { %s1578_s17 = smov 64   ;;  %s1579_s18 = smov 4  }
  0x1d   : > { %1375 = dma.hbm_to_vmem [thread:$0]  (!%p1373_p12), %s1805_s1, 6272, %s217_s15, [#allocation3], %s1578_s17, %s1578_s17, %s1579_s18  }
  0x1e   : > { %255 = sbr.rel (%p1672_p10) target bundleno = 1027 (0x403), region = 48 }
  0x23   : > { %1554 = dma.done.wait (%p1380_p9), [#allocation3], 6272  }
  0x24   : > { %1556 = vsyncadd (%p1380_p9), [#allocation3], 4294961024  ;;  %v1420_v0 = vld [vmem:[#allocation2 + $0x78] sm:$0xff]   ;;  %v1424_v4 = vld [vmem:[#allocation2 + $0x70] sm:$0xff]   ;;  %p287_p6 = scmp.lt.s32.totalorder %s1644_s28, 1  ;;  %v1580_v44 = vmov 0.0  }
  0x25   : > { %v1421_v1 = vld [vmem:[#allocation2 + $0x38] sm:$0xff]   ;;  %1245 = vmatprep.subr.bf16.mxu0 %v1420_v0  ;;  %v1425_v5 = vld [vmem:[#allocation2 + $0x30] sm:$0xff]   ;;  %v1428_v8 = vld [vmem:[#allocation2 + $0x68] sm:$0xff]   ;;  %vm1581_vm0 = vmmov 0   ;;  %vm706_vm1 = vcmask 130048   ;;  %vm1024_vm2 = vcmask 523264  }
  0x26   : > { %v1422_v2 = vld [vmem:[#allocation2 + $0xf8] sm:$0xff]   ;;  %1246 = vmatpush3.bf16.msra.mxu0 %v1421_v1  ;;  %v1426_v6 = vld [vmem:[#allocation2 + $0xf0] sm:$0xff]   ;;  %v1429_v9 = vld [vmem:[#allocation2 + $0x28] sm:$0xff]   ;;  %s288_s21 = scalar_select %p287_p6, %s1644_s28, 1  ;;  %vm1068_vm3 = vcmask 80896  }
  0x27   : > { %v1423_v3 = vld [vmem:[#allocation2 + $0xb8] sm:$0xff]   ;;  %1267 = vmatprep.subr.bf16.mxu1 %v1422_v2  ;;  %1247 = vmatprep.subr.bf16.mxu0 %v1424_v4  ;;  %v1427_v7 = vld [vmem:[#allocation2 + $0xb0] sm:$0xff]   ;;  %v1430_v10 = vld [vmem:[#allocation2 + $0xe8] sm:$0xff]   ;;  %s284_s14 = sand.u32 1, %s1567_s25   ;;  %s1242_s16 = sshll.u32 %s1644_s28, 7 }
  0x28   : > { %1268 = vmatpush3.bf16.msra.mxu1 %v1423_v3  ;;  %v1431_v11 = vld [vmem:[#allocation2 + $0xa8] sm:$0xff]   ;;  %v1432_v12 = vld [vmem:[#allocation2 + $0x60] sm:$0xff]   ;;  %v1436_v16 = vld [vmem:[#allocation2 + $0x58] sm:$0xff]   ;;  %s1365_s22 = smul.u32 56, %s288_s21  ;;  %s1173_s15 = sshll.u32 %s284_s14, 3 }
  0x29   : > { %1269 = vmatprep.subr.bf16.mxu1 %v1426_v6  ;;  %v1433_v13 = vld [vmem:[#allocation2 + $0x20] sm:$0xff]   ;;  %v1437_v17 = vld [vmem:[#allocation2 + $0x18] sm:$0xff]   ;;  %v1440_v20 = vld [vmem:[#allocation2 + $0x50] sm:$0xff]   ;;  %s286_s17 = scalar_lea.vmem [#allocation5], %s1173_s15  ;;  %s1094_s21 = scalar_lea.hbm %s1811_s7, %s1242_s16 }
  0x2a   : > { %1248 = vmatpush3.bf16.msra.mxu0 %v1425_v5  ;;  %v1434_v14 = vld [vmem:[#allocation2 + $0xe0] sm:$0xff]   ;;  %v1438_v18 = vld [vmem:[#allocation2 + $0xd8] sm:$0xff]   ;;  %v1441_v21 = vld [vmem:[#allocation2 + $0x10] sm:$0xff]   ;;  %s1694_s8 = scalar_lea.vmem %s1804_s0, %s1365_s22  ;;  %s1096_s18 = sshll.u32 %s286_s17, 4  ;;  %s1097_s18 = int_to_ptr.vmem [resolvable:$true] %s1096_s18 }
  0x2b   : > { %1249 = vmatprep.subr.bf16.mxu0 %v1428_v8  ;;  %v1435_v15 = vld [vmem:[#allocation2 + $0xa0] sm:$0xff]   ;;  %v1439_v19 = vld [vmem:[#allocation2 + $0x98] sm:$0xff]   ;;  %v1442_v22 = vld [vmem:[#allocation2 + $0xd0] sm:$0xff]   ;;  %s1083_s22 = scalar_lea.sflag [#allocation4], %s284_s14  ;;  %s1511_s23 = scalar_lea.vmem %s1097_s18, 128 }
  0x2c   : > { %1270 = vmatpush3.bf16.msra.mxu1 %v1427_v7  ;;  %v1443_v23 = vld [vmem:[#allocation2 + $0x90] sm:$0xff]   ;;  %v1444_v24 = vld [vmem:[#allocation2 + $0x48] sm:$0xff]   ;;  %v1448_v28 = vld [vmem:[#allocation2 + $0x40] sm:$0xff]   ;;  %p1512_p8 = scmp.ne.s32.totalorder %s1097_s18, %s1511_s23  ;;  %s1582_s29 = smov [#allocation5]  }
  0x2d   : > { %1271 = vmatprep.subr.bf16.mxu1 %v1430_v10  ;;  %v1445_v25 = vld [vmem:[#allocation2 + $0x8] sm:$0xff]   ;;  %v1449_v29 = vld [vmem:[#allocation2] sm:$0xff]   ;;  %v1452_v36 = vld [vmem:[#allocation2 + $0x178] sm:$0xff]  }
  0x2e   : > { %1250 = vmatpush3.bf16.msra.mxu0 %v1429_v9  ;;  %v1446_v26 = vld [vmem:[#allocation2 + $0xc8] sm:$0xff]   ;;  %v1450_v30 = vld [vmem:[#allocation2 + $0xc0] sm:$0xff]   ;;  %v296_v37 = vld [vmem:[%s1694_s8 + $0x18] sm:$0xff]  ;;  %p1513_p9 = pnand %p1512_p8, %p1661_p5 }
  0x2f   : > { %1251 = vmatprep.subr.bf16.mxu0 %v1432_v12  ;;  %v1447_v27 = vld [vmem:[#allocation2 + $0x88] sm:$0xff]   ;;  %v1451_v33 = vld [vmem:[#allocation2 + $0x80] sm:$0xff]   ;;  %v303_v38 = vpack.c.bf16 %v296_v37, %v296_v37  ;;  %v1453_v39 = vld [vmem:[#allocation2 + $0x138] sm:$0xff]  }
  0x30   : > { %1272 = vmatpush3.bf16.msra.mxu1 %v1431_v11  ;;  %v294_v31 = vld [vmem:[%s1694_s8 + $0x8] sm:$0xff]  ;;  %v293_v34 = vld [vmem:[%s1694_s8] sm:$0xff]  ;;  %v295_v40 = vld [vmem:[%s1694_s8 + $0x10] sm:$0xff]  ;;  %p1514_p10 = pneg %p1513_p9 }
  0x31   : > { %1273 = vmatprep.subr.bf16.mxu1 %v1434_v14  ;;  %v301_v32 = vpack.c.bf16 %v294_v31, %v294_v31  ;;  %v300_v35 = vpack.c.bf16 %v293_v34, %v293_v34  ;;  %782 = vmatprep.mubr.bf16.mxu1 %v303_v38  ;;  %v302_v41 = vpack.c.bf16 %v295_v40, %v295_v40  ;;  %v1454_v42 = vld [vmem:[#allocation2 + $0x170] sm:$0xff]   ;;  %v1456_v45 = vld [vmem:[#allocation2 + $0x168] sm:$0xff]   ;;  %v1458_v47 = vld [vmem:[#allocation2 + $0x160] sm:$0xff]  }
  0x32   : > { %1252 = vmatpush3.bf16.msra.mxu0 %v1433_v13  ;;  %v1455_v43 = vld [vmem:[#allocation2 + $0x130] sm:$0xff]   ;;  %v1457_v46 = vld [vmem:[#allocation2 + $0x128] sm:$0xff]   ;;  %v1459_v48 = vld [vmem:[#allocation2 + $0x120] sm:$0xff]  }
  0x33   : > { %1253 = vmatprep.subr.bf16.mxu0 %v1436_v16  ;;  %742 = vmatprep.mubr.bf16.mxu0 %v301_v32  ;;  %v1460_v49 = vld [vmem:[#allocation2 + $0x158] sm:$0xff]   ;;  %v1462_v51 = vld [vmem:[#allocation2 + $0x150] sm:$0xff]   ;;  %v1468_v53 = vld [vmem:[#allocation2 + $0x180] sm:$0xff]  }
  0x34   : > { %1274 = vmatpush3.bf16.msra.mxu1 %v1435_v15  ;;  %v1461_v50 = vld [vmem:[#allocation2 + $0x118] sm:$0xff]   ;;  %v1463_v52 = vld [vmem:[#allocation2 + $0x110] sm:$0xff]   ;;  %v298_v54 = vld [vmem:[%s1694_s8 + $0x28] sm:$0xff] }
  0x35   : > { %1275 = vmatprep.subr.bf16.mxu1 %v1438_v18  ;;  %v1464_v55 = vld [vmem:[#allocation2 + $0x148] sm:$0xff]   ;;  %v305_v56 = vpack.c.bf16 %v298_v54, %v298_v54  ;;  %v299_v57 = vld [vmem:[%s1694_s8 + $0x30] sm:$0xff]  ;;  %v1466_v60 = vld [vmem:[#allocation2 + $0x140] sm:$0xff]  }
  0x36   : > { %1254 = vmatpush3.bf16.msra.mxu0 %v1437_v17  ;;  %v306_v58 = vpack.c.bf16 %v299_v57, %v299_v57  ;;  %v1465_v59 = vld [vmem:[#allocation2 + $0x108] sm:$0xff]   ;;  %v1467_v61 = vld [vmem:[#allocation2 + $0x100] sm:$0xff]   ;;  %v1469_v0 = vld [vmem:[%s1807_s3 + $0x38] sm:$0xff]  }
  0x37   : > { %1255 = vmatprep.subr.bf16.mxu0 %v1440_v20  ;;  %v297_v62 = vld [vmem:[%s1694_s8 + $0x20] sm:$0xff]  ;;  %v1470_v1 = vld [vmem:[%s1807_s3 + $0x30] sm:$0xff]   ;;  %v1471_v2 = vld [vmem:[%s1807_s3 + $0x28] sm:$0xff]   ;;  %s1515_s8 = sshll.u32 %s1582_s29, 4  ;;  %s1516_s8 = int_to_ptr.vmem [resolvable:$false] %s1515_s8 }
  0x38   : > { %1276 = vmatpush3.bf16.msra.mxu1 %v1439_v19  ;;  %v304_v63 = vpack.c.bf16 %v297_v62, %v297_v62  ;;  %v1472_v3 = vld [vmem:[%s1807_s3 + $0x20] sm:$0xff]   ;;  %v1473_v4 = vld [vmem:[%s1807_s3 + $0x18] sm:$0xff]   ;;  %v1474_v5 = vld [vmem:[%s1807_s3 + $0x10] sm:$0xff]   ;;  %s1517_s28 = scalar_lea.vmem %s1516_s8, 256  ;;  %p1518_p11 = scmp.lt.s32.totalorder %s1097_s18, %s1516_s8 }
  0x39   : > { %1277 = vmatprep.subr.bf16.mxu1 %v1442_v22  ;;  %v1475_v6 = vld [vmem:[%s1807_s3 + $0x8] sm:$0xff]   ;;  %v1476_v7 = vld [vmem:[%s1807_s3] sm:$0xff]   ;;  %v1477_v8 = vld [vmem:[%s1809_s5 + $0x18] sm:$0xff]   ;;  %p1519_p12 = scmp.lt.s32.totalorder %s1517_s28, %s1511_s23 }
  0x3a   : > { %1256 = vmatpush3.bf16.msra.mxu0 %v1441_v21  ;;  %v1478_v9 = vld [vmem:[%s1809_s5 + $0x10] sm:$0xff]   ;;  %v1480_v37 = vld [vmem:[%s1809_s5] sm:$0xff]  }
  0x3b   : > { %1257 = vmatprep.subr.bf16.mxu0 %v1444_v24  ;;  %v1226_v38 = vld [vmem:[%s1808_s4] ss:$0 sm:$0xff]  ;;  %p1520_p13 = por %p1519_p12, %p1518_p11 }
  0x3c   : > { %1278 = vmatpush3.bf16.msra.mxu1 %v1443_v23  ;;  %v1175_v23 = vld [vmem:[%s1806_s2] ss:$0 sm:$0xff] }
  0x3d   : > { %1279 = vmatprep.subr.bf16.mxu1 %v1446_v26  ;;  %p1521_p0 = pnand %p1520_p13, %p1514_p10 }
  0x3e   : > { %1258 = vmatpush3.bf16.msra.mxu0 %v1445_v25 }
  0x3f   : > { %1259 = vmatprep.subr.bf16.mxu0 %v1448_v28 }
  0x40   : > { %1280 = vmatpush3.bf16.msra.mxu1 %v1447_v27 }
  0x41   : > { %1281 = vmatprep.subr.bf16.mxu1 %v1450_v30 }
  0x42   : > { %1260 = vmatpush3.bf16.msra.mxu0 %v1449_v29 }
  0x43   : > { %1289 = vmatprep.subr.bf16.mxu0 %v1452_v36  ;;  %v1479_v36 = vld [vmem:[%s1809_s5 + $0x8] sm:$0xff]  }
  0x44   : > { %1282 = vmatpush3.bf16.msra.mxu1 %v1451_v33 }
  0x45   : > { %743 = vmatmul.mubr.bf16.vlgmr.msra.gmra.mxu0 %v300_v35  ;;  %1327 = vmatprep.subr.bf16.mxu1 %v1580_v44 }
  0x46   : > { %1290 = vmatpush3.bf16.msra.mxu0 %v1453_v39  ;;  %822 = vmatprep.mubr.bf16.mxu0 %v305_v56 }
  0x47   : > { %783 = vmatmul.mubr.bf16.vlgmr.msra.gmra.mxu1 %v302_v41  ;;  %1291 = vmatprep.subr.bf16.mxu0 %v1454_v42 }
  0x48   : > { %1329 = vmatprep.mubr.msk.bf16.mxu1 %vm1581_vm0, %v1580_v44  ;;  %1328 = vmatpush3.bf16.msra.mxu1 %v1468_v53 }
  0x49   : > { %1333 = vmatprep.subr.bf16.mxu1 %v1580_v44 }
  0x4a   : > { %1292 = vmatpush3.bf16.msra.mxu0 %v1455_v43 }
  0x4b   : > { %1293 = vmatprep.subr.bf16.mxu0 %v1456_v45 }
  0x4e   : > { %1294 = vmatpush3.bf16.msra.mxu0 %v1457_v46 }
  0x4f   : > { %1295 = vmatprep.subr.bf16.mxu0 %v1458_v47  ;;  %1330 = vmatmul.mubr.msk.bf16.vlgmr.msra.gmra.mxu1 %vm706_vm1, %v306_v58 }
  0x50   : > { %1349 = vmatprep.mubr.msk.bf16.mxu1 %vm1581_vm0, %v1580_v44  ;;  %1334 = vmatpush3.bf16.msra.mxu1 %v1469_v0 }
  0x51   : > { %1335 = vmatprep.subr.bf16.mxu1 %v1580_v44 }
  0x52   : > { %1296 = vmatpush3.bf16.msra.mxu0 %v1459_v48 }
  0x53   : > { %1297 = vmatprep.subr.bf16.mxu0 %v1460_v49 }
  0x54   : > { %1336 = vmatpush3.bf16.msra.mxu1 %v1470_v1 }
  0x55   : > { %1337 = vmatprep.subr.bf16.mxu1 %v1580_v44 }
  0x56   : > { %1298 = vmatpush3.bf16.msra.mxu0 %v1461_v50 }
  0x57   : > { %1299 = vmatprep.subr.bf16.mxu0 %v1462_v51 }
  0x58   : > { %1338 = vmatpush3.bf16.msra.mxu1 %v1471_v2 }
  0x59   : > { %1339 = vmatprep.subr.bf16.mxu1 %v1580_v44 }
  0x5a   : > { %1300 = vmatpush3.bf16.msra.mxu0 %v1463_v52 }
  0x5b   : > { %1301 = vmatprep.subr.bf16.mxu0 %v1464_v55 }
  0x5c   : > { %1340 = vmatpush3.bf16.msra.mxu1 %v1472_v3 }
  0x5d   : > { %1341 = vmatprep.subr.bf16.mxu1 %v1580_v44 }
  0x5e   : > { %1302 = vmatpush3.bf16.msra.mxu0 %v1465_v59 }
  0x5f   : > { %1303 = vmatprep.subr.bf16.mxu0 %v1466_v60 }
  0x60   : > { %1342 = vmatpush3.bf16.msra.mxu1 %v1473_v4 }
  0x61   : > { %1343 = vmatprep.subr.bf16.mxu1 %v1580_v44 }
  0x62   : > { %1304 = vmatpush3.bf16.msra.mxu0 %v1467_v61 }
  0x63   : > { %1353 = vmatprep.subr.bf16.mxu0 %v1580_v44 }
  0x64   : > { %1344 = vmatpush3.bf16.msra.mxu1 %v1474_v5 }
  0x65   : > { %823 = vmatmul.mubr.bf16.vlgmr.msra.gmra.mxu0 %v304_v63  ;;  %1345 = vmatprep.subr.bf16.mxu1 %v1580_v44 }
  0x66   : > { %1361 = vmatprep.mubr.msk.bf16.mxu0 %vm1581_vm0, %v1580_v44  ;;  %1354 = vmatpush3.bf16.msra.mxu0 %v1477_v8 }
  0x67   : > { %1355 = vmatprep.subr.bf16.mxu0 %v1580_v44 }
  0x68   : > { %1346 = vmatpush3.bf16.msra.mxu1 %v1475_v6 }
  0x69   : > { %1347 = vmatprep.subr.bf16.mxu1 %v1580_v44 }
  0x6a   : > { %1356 = vmatpush3.bf16.msra.mxu0 %v1478_v9 }
  0x6b   : > { %1357 = vmatprep.subr.bf16.mxu0 %v1580_v44 }
  0x6c   : > { %1348 = vmatpush3.bf16.msra.mxu1 %v1476_v7 }
  0x6e   : > { %1358 = vmatpush3.bf16.msra.mxu0 %v1479_v36 }
  0x6f   : > { %1359 = vmatprep.subr.bf16.mxu0 %v1580_v44  ;;  %v1235_v44 = vld [vmem:[%s1810_s6] ss:$0 sm:$0xff] }
  0x72   : > { %1360 = vmatpush3.bf16.msra.mxu0 %v1480_v37 }
 0x105   : > { %v1261_v10 = vpop.f32.mrf.mxu0 }
 0x107   : > { %v1262_v11 = vpop.f32.mrf.mxu0  ;;  %v1283_v12 = vpop.f32.mrf.mxu1 }
 0x108   : > { %v1263_v22 = vadd.f32 %v1262_v11, %v1261_v10 }
 0x109   : > { %v1264_v13 = vpop.f32.mrf.mxu0  ;;  %v1284_v14 = vpop.f32.mrf.mxu1 }
 0x10a   : > { %v745_v24 = vadd.f32 %v1263_v22, %v1175_v23  ;;  %v1285_v25 = vadd.f32 %v1284_v14, %v1283_v12 }
 0x10b   : > { %v1265_v15 = vpop.f32.mrf.mxu0  ;;  %v1286_v16 = vpop.f32.mrf.mxu1 }
 0x10c   : > { %v785_v28 = vadd.f32 %v1285_v25, %v745_v24 }
 0x10d   : > { %v1287_v17 = vpop.f32.mrf.mxu1 }
 0x10f   : > { %v864_v18 = vpop.f32.mrf.mxu1 }
 0x111   : > { %v1331_v19 = vpop.f32.mrf.mxu1 }
 0x113   : > { %v867_v20 = vpop.f32.mrf.mxu1 }
 0x115   : > { %v1332_v21 = vpop.f32.mrf.mxu1 }
 0x125   : > { %v1305_v26 = vpop.f32.mrf.mxu0 }
 0x127   : > { %v1306_v27 = vpop.f32.mrf.mxu0 }
 0x128   : > { %v1307_v29 = vadd.f32 %v1306_v27, %v1305_v26 }
 0x129   : > { %v1308_v30 = vpop.f32.mrf.mxu0 }
 0x12a   : > { %v825_v31 = vadd.f32 %v1307_v29, %v785_v28 }
 0x12b   : > { %v1309_v32 = vpop.f32.mrf.mxu0 }
 0x12c   : > { %v865_v33 = vadd.f32 %v864_v18, %v825_v31 }
 0x12e   : > { %v870_v34 = vmax.f32 %v865_v33, 0.0 }
 0x130   : > { %v871_v35 = vpack.c.bf16 %v870_v34, %v870_v34 }
 0x132   : > { %1350 = vmatmul.mubr.bf16.vlgmr.msra.gmra.mxu1 %v871_v35 }
 0x1f2   : > { %v977_v39 = vpop.f32.mrf.mxu1 }
 0x1f3   : > { %v978_v40 = vadd.f32 %v1226_v38, %v977_v39 }
 0x1f4   : > { %v1351_v41 = vpop.f32.mrf.mxu1 }
 0x1f5   : > { %v983_v42 = vmax.f32 %v978_v40, 0.0 }
 0x1f6   : > { %v980_v43 = vpop.f32.mrf.mxu1 }
 0x1f7   : > { %v984_v45 = vpack.c.bf16 %v983_v42, %v983_v42 }
 0x1f8   : > { %v1352_v46 = vpop.f32.mrf.mxu1 }
 0x1f9   : > { %1362 = vmatmul.mubr.msk.bf16.vlgmr.msra.gmra.mxu0 %vm1024_vm2, %v984_v45 }
 0x2b9   : > { %v1062_v47 = vpop.f32.mrf.mxu0 }
 0x2ba   : > { %v1063_v48 = vadd.f32 %v1235_v44, %v1062_v47 }
 0x2bb   : > { %v1363_v49 = vpop.f32.mrf.mxu0 }
 0x2bc   : > { %v1069_v50 = vsel %vm1068_vm3, %v1063_v48, -inf }
 0x2bd   : > { %1070 = vmax.xlane.f32.xlu0 %v1069_v50  ;;  %v1065_v51 = vpop.f32.mrf.mxu0 }
 0x2bf   : > { %v1364_v52 = vpop.f32.mrf.mxu0 }
 0x346   : > { %v1071_v53 = vpop.xlane.xlu0 %1070 }
 0x347   : > { %v1072_v54 = vsub.f32 %v1063_v48, %v1071_v53 }
 0x349   : > { %v1073_v55 = vmul.f32 1.442695, %v1072_v54 }
 0x34b   : > { %1481 = vpow2.f32 %v1073_v55 }
 0x358   : > { %v1482_v56 = vpop.eup %1481 }
 0x359   : > { %v1075_v57 = vsel %vm1068_vm3, %v1482_v56, 0.0 }
 0x35a   : > { %1076 = vadd.xlane.f32.xlu0 %v1075_v57 }
 0x3e3   : > { %v1077_v58 = vpop.xlane.xlu0 %1076 }
 0x3e4   : > { %1483 = vlog2.f32 %v1077_v58 }
 0x3f1   : > { %v1484_v59 = vpop.eup %1483 }
 0x3f2   : > { %v1079_v60 = vmul.f32 0.6931472, %v1484_v59 }
 0x3f4   : > { %v1080_v61 = vsub.f32 %v1072_v54, %v1079_v60 }
 0x3f6   : > { %1081 = vst.msk [vmem:[%s286_s17] sm:$0xff] %vm1068_vm3, %v1080_v61 }
 0x3f7   : > { %1524 = shalt.err (!%p1521_p0)
}
 0x3f8   : > { %s1525_s9 = scalar_lea.hbm %s1094_s21, 128  ;;  %s1529_s15 = scalar_lea.hbm %s1811_s7, 256 }
 0x3f9   : > { %p1526_p1 = scmp.ne.s32.totalorder %s1094_s21, %s1525_s9  ;;  %p1530_p4 = scmp.lt.s32.totalorder %s1094_s21, %s1811_s7 }
 0x3fa   : > { %p1531_p7 = scmp.lt.s32.totalorder %s1529_s15, %s1525_s9 }
 0x3fb   : > { %p1527_p2 = pnand %p1526_p1, %p1661_p5 }
 0x3fc   : > { %p1532_p6 = por %p1531_p7, %p1530_p4 }
 0x3fd   : > { %p1528_p3 = pneg %p1527_p2 }
 0x3ff   : > { %p1533_p8 = pnand %p1532_p6, %p1528_p3 }
 0x401   : > { %1536 = shalt.err (!%p1533_p8)
}
 0x402   : > { %1370 = dma.vmem_to_hbm [thread:$0]  (%p1661_p5), %s1097_s18, 128, %s1094_s21, %s1083_s22  }
 0x403 PF: > { %p1382_p9 = scmp.ge.s32.totalorder %s1575_s27, 2  ;;  %s1108_s19 = sand.u32 1, %s1563_s24  }
 0x404   : > { %p1815_p10 = scmp.ne.s32.totalorder %s1813_s12, 0  ;;  %s1109_s20 = scalar_lea.sflag [#allocation4], %s1108_s19 }
 0x406   : > { %p1377_p11 = pnand %p1382_p9, %p1815_p10 }
 0x408   : > { %p1378_p12 = pneg %p1377_p11 }
 0x40a   : > { %1558 = dma.done.wait (%p1378_p12), %s1109_s20, 128  }
 0x40b   : > { %1560 = vsyncadd (%p1378_p12), %s1109_s20, 4294967168  ;;  %p18_p13 = scmp.ge.s32.totalorder %s1648_s30, 4   ;;  %s1816_s24 = smov %s1567_s25 }
 0x40c   : > { %s1817_s25 = smov %s1571_s26  ;;  %s1818_s26 = smov %s1659_s10 }
 0x40d   : > { %s1819_s27 = smov %s1648_s30  ;;  %20 = sbr.rel (!%p18_p13) target bundleno = 4 (0x4), region = 88 }
 0x412   :  { %1114 = vsyncpa [#allocation3], 1 }
 0x413   :  { %1116 = vsyncpa [#allocation3 + $0x1], 1 }
 0x414   :  { %1117 = vsyncpa [#allocation4], 1 }
 0x415   :  { %1119 = vsyncpa [#allocation4 + $0x1], 1 }

</bundles_post_ra>
